<compile_context>
chip_gen: v7x
topology: tpu7x:2x2x1
jax: 0.10.0
libtpu: 0.0.40
codegen_flags: <defaults>
</compile_context>

<pallas_src>
import functools

import jax
import jax.numpy as jnp
from jax.experimental import pallas as pl
from jax.experimental.pallas import tpu as pltpu


def _round_up(x, m):
    return (x + m - 1) // m * m


def _softplus(x):
    # Numerically stable softplus using only exp/log/abs/max.
    return jnp.maximum(x, 0.0) + jnp.log(1.0 + jnp.exp(-jnp.abs(x)))


def _fused_kernel(px_ref, pc_ref, wd_ref, wc_ref, bv_ref, o_ref, *, cout):
    # px_ref: (1, Kx, TM)  bf16/f32  input patches (K-major, pixels on lanes)
    # pc_ref: (1, Kc, TM)  bf16/f32  context patches
    # wd_ref: (Cout, Kx)   f32       direction weights
    # wc_ref: (2*Cout, Kc) f32       [normalized cscale ; cbias weight]
    # bv_ref: (2*Cout, 1)  f32       [cscalebias ; cbias bias]
    # o_ref : (1, Cout, TM) f32
    px = px_ref[0, :, :].astype(jnp.float32)                       # (Kx, TM)
    pc = pc_ref[0, :, :].astype(jnp.float32)                       # (Kc, TM)

    direction = jnp.dot(wd_ref[...], px,
                        preferred_element_type=jnp.float32)        # (Cout, TM)
    ctx_pre = jnp.dot(wc_ref[...], pc,
                      preferred_element_type=jnp.float32) + bv_ref[...]  # (2Cout, TM)

    scale = _softplus(ctx_pre[:cout, :])                           # (Cout, TM)
    bias = ctx_pre[cout:, :]                                       # (Cout, TM)

    o_ref[0, :, :] = scale * direction + bias


def _im2col_t(x, kh, kw, stride, padding):
    """x: (N, C, H, W) -> patches (N, C*kh*kw, OH*OW), K ordered (c, i, j)
    to match PyTorch's weight.reshape(Cout, C*kh*kw)."""
    n, c, h, w = x.shape
    xp = jnp.pad(x, ((0, 0), (0, 0), (padding, padding), (padding, padding)))
    oh = (h + 2 * padding - kh) // stride + 1
    ow = (w + 2 * padding - kw) // stride + 1
    taps = []
    for i in range(kh):
        for j in range(kw):
            taps.append(xp[:, :, i:i + stride * oh:stride, j:j + stride * ow:stride])
    p = jnp.stack(taps, axis=2)                      # (N, C, kh*kw, OH, OW)
    p = p.reshape(n, c * kh * kw, oh * ow)           # K-major, pixels last
    return p, oh, ow


def context_softplus_wn_conv2d(x, ctx, direction, cscale, cscalebias,
                               cbias_w, cbias_b, *, stride=1, padding=0,
                               patch_dtype=jnp.bfloat16):
    """x:   (N, Cin,  H, W)   ctx: (N, Cctx, H, W)
       direction: (Cout, Cin, KH, KW)      (in_norm=False -> used as-is)
       cscale:    (Cout, Cctx, KH, KW)     (ctx_norm=True -> L2-normalized per out-channel)
       cscalebias: (Cout,)
       cbias_w:   (Cout, Cctx, KH, KW)     cbias_b: (Cout,)
       returns (N, Cout, OH, OW) float32 (NCHW, like PyTorch)."""
    cout, cin, kh, kw = direction.shape
    cctx = cscale.shape[1]
    n = x.shape[0]

    px, oh, ow = _im2col_t(x, kh, kw, stride, padding)     # (N, Kx, OHW)
    pc, _, _ = _im2col_t(ctx, kh, kw, stride, padding)     # (N, Kc, OHW)
    kx = cin * kh * kw
    kc = cctx * kh * kw
    ohw = oh * ow

    # Pad the pixel axis to a lane-friendly tile multiple (unmasked vst).
    tm = min(512, _round_up(ohw, 128))
    ohw_pad = _round_up(ohw, tm)
    if ohw_pad != ohw:
        pad = ((0, 0), (0, 0), (0, ohw_pad - ohw))
        px = jnp.pad(px, pad)
        pc = jnp.pad(pc, pad)
    px = px.astype(patch_dtype)
    pc = pc.astype(patch_dtype)

    # Weight prep (tiny, f32, resident in VMEM for the whole grid).
    wd = direction.reshape(cout, kx).astype(jnp.float32)             # (Cout, Kx)
    norm = jnp.sqrt(jnp.sum(jnp.square(cscale), axis=(1, 2, 3), keepdims=True))
    cscale_n = (cscale / norm).reshape(cout, kc)
    wc = jnp.concatenate([cscale_n, cbias_w.reshape(cout, kc)],
                         axis=0).astype(jnp.float32)                 # (2Cout, Kc)
    bv = jnp.concatenate([cscalebias.reshape(cout, 1),
                          cbias_b.reshape(cout, 1)],
                         axis=0).astype(jnp.float32)                 # (2Cout, 1)

    grid = (n, ohw_pad // tm)
    kernel = functools.partial(_fused_kernel, cout=cout)

    out = pl.pallas_call(
        kernel,
        out_shape=jax.ShapeDtypeStruct((n, cout, ohw_pad), jnp.float32),
        grid_spec=pltpu.PrefetchScalarGridSpec(
            num_scalar_prefetch=0,
            grid=grid,
            in_specs=[
                pl.BlockSpec((1, kx, tm), lambda b, m: (b, 0, m)),
                pl.BlockSpec((1, kc, tm), lambda b, m: (b, 0, m)),
                pl.BlockSpec((cout, kx), lambda b, m: (0, 0)),
                pl.BlockSpec((2 * cout, kc), lambda b, m: (0, 0)),
                pl.BlockSpec((2 * cout, 1), lambda b, m: (0, 0)),
            ],
            out_specs=pl.BlockSpec((1, cout, tm), lambda b, m: (b, 0, m)),
        ),
        compiler_params=pltpu.CompilerParams(
            dimension_semantics=("parallel", "parallel"),
            vmem_limit_bytes=32 * 1024 * 1024,
        ),
    )(px, pc, wd, wc, bv)

    # (N, Cout, OHW_pad) -> (N, Cout, OH, OW): a slice + reshape, no transpose.
    return out[:, :, :ohw].reshape(n, cout, oh, ow)


def _reference(x, ctx, direction, cscale, cscalebias, cbias_w, cbias_b,
               *, stride=1, padding=0):
    dn = jax.lax.conv_dimension_numbers(x.shape, direction.shape,
                                        ("NCHW", "OIHW", "NCHW"))
    conv = lambda inp, w: jax.lax.conv_general_dilated(
        inp, w, window_strides=(stride, stride),
        padding=[(padding, padding), (padding, padding)], dimension_numbers=dn)
    norm = jnp.sqrt(jnp.sum(jnp.square(cscale), axis=(1, 2, 3), keepdims=True))
    scale = jax.nn.softplus(conv(ctx, cscale / norm)
                            + cscalebias.reshape(1, -1, 1, 1))
    bias = conv(ctx, cbias_w) + cbias_b.reshape(1, -1, 1, 1)
    return scale * conv(x, direction) + bias


if __name__ == "__main__":
    # Small shapes consistent with the module.
    N, Cin, Cctx, Cout = 2, 4, 4, 8
    H = W = 16
    K = 3
    stride, padding = 1, 1

    key = jax.random.PRNGKey(0)
    kx, kc, kd, ks, ksb, kbw, kbb = jax.random.split(key, 7)

    x = jax.random.normal(kx, (N, Cin, H, W), jnp.float32)
    ctx = jax.random.normal(kc, (N, Cctx, H, W), jnp.float32)

    fan_in_d = Cin * K * K
    fan_in_c = Cctx * K * K
    direction = jax.random.normal(kd, (Cout, Cin, K, K), jnp.float32) * (1.0 / fan_in_d) ** 0.5
    cscale = jax.random.normal(ks, (Cout, Cctx, K, K), jnp.float32)           # normal_(0, 1)
    bound = 1.0 / fan_in_c ** 0.5
    cscalebias = jax.random.uniform(ksb, (Cout,), jnp.float32, -bound, bound)
    cbias_w = jax.random.normal(kbw, (Cout, Cctx, K, K), jnp.float32) * (1.0 / fan_in_c) ** 0.5
    cbias_b = jax.random.normal(kbb, (Cout,), jnp.float32) * 0.01

    # Quantize the streamed operands to bf16 up front; the same values feed both
    # kernel and reference, so the check isolates kernel correctness.
    x_q = x.astype(jnp.bfloat16).astype(jnp.float32)
    ctx_q = ctx.astype(jnp.bfloat16).astype(jnp.float32)

    fwd = jax.jit(functools.partial(context_softplus_wn_conv2d,
                                    stride=stride, padding=padding))
    out = fwd(x_q, ctx_q, direction, cscale, cscalebias, cbias_w, cbias_b)
    out = jax.block_until_ready(out)

    ref = _reference(x_q, ctx_q, direction, cscale, cscalebias, cbias_w, cbias_b,
                     stride=stride, padding=padding)

    assert out.shape == (N, Cout, H, W), out.shape
    assert jnp.allclose(out, ref, atol=5e-3, rtol=5e-3), \
        float(jnp.max(jnp.abs(out - ref)))

    print("KERNEL_OK")
</pallas_src>

<mosaic_0001>
module attributes {stable_mosaic.version = 11 : i64} {
  func.func @_fused_kernel(%arg0: i32, %arg1: i32, %arg2: memref<1x36x256xbf16, #tpu.memory_space<vmem>>, %arg3: memref<1x36x256xbf16, #tpu.memory_space<vmem>>, %arg4: memref<8x36xf32, #tpu.memory_space<vmem>>, %arg5: memref<16x36xf32, #tpu.memory_space<vmem>>, %arg6: memref<16x1xf32, #tpu.memory_space<vmem>>, %arg7: memref<1x8x256xf32, #tpu.memory_space<vmem>>) attributes {dimension_semantics = [#tpu.dimension_semantics<parallel>, #tpu.dimension_semantics<parallel>], iteration_bounds = array<i64: 2, 1>, scalar_prefetch = 0 : i64, scratch_operands = 0 : i64, tpu.core_type = #tpu.core_type<tc>, window_params = [{transform_indices = @transform_0, window_bounds = array<i64: 1, 36, 256>}, {transform_indices = @transform_1, window_bounds = array<i64: 1, 36, 256>}, {pipeline_mode = #tpu.pipeline_mode<synchronous>, transform_indices = @transform_2, window_bounds = array<i64: 8, 36>}, {pipeline_mode = #tpu.pipeline_mode<synchronous>, transform_indices = @transform_3, window_bounds = array<i64: 16, 36>}, {pipeline_mode = #tpu.pipeline_mode<synchronous>, transform_indices = @transform_4, window_bounds = array<i64: 16, 1>}, {transform_indices = @transform_5, window_bounds = array<i64: 1, 8, 256>}]} {
    %c0 = arith.constant 0 : index
    %c0_0 = arith.constant 0 : index
    %c0_1 = arith.constant 0 : index
    %0 = vector.load %arg2[%c0, %c0_0, %c0_1] : memref<1x36x256xbf16, #tpu.memory_space<vmem>>, vector<1x36x256xbf16>
    %1 = vector.shape_cast %0 : vector<1x36x256xbf16> to vector<36x256xbf16>
    %2 = arith.extf %1 : vector<36x256xbf16> to vector<36x256xf32>
    %c0_2 = arith.constant 0 : index
    %c0_3 = arith.constant 0 : index
    %c0_4 = arith.constant 0 : index
    %3 = vector.load %arg3[%c0_2, %c0_3, %c0_4] : memref<1x36x256xbf16, #tpu.memory_space<vmem>>, vector<1x36x256xbf16>
    %4 = vector.shape_cast %3 : vector<1x36x256xbf16> to vector<36x256xbf16>
    %5 = arith.extf %4 : vector<36x256xbf16> to vector<36x256xf32>
    %c0_5 = arith.constant 0 : index
    %c0_6 = arith.constant 0 : index
    %6 = vector.load %arg4[%c0_5, %c0_6] : memref<8x36xf32, #tpu.memory_space<vmem>>, vector<8x36xf32>
    %cst = arith.constant dense<0.000000e+00> : vector<8x256xf32>
    %7 = tpu.matmul %6, %2, %cst {dimension_numbers = #tpu.dot_dimension_numbers<[1], [0], [0], [1], [0, 0, 1, 1], [], []>} : vector<8x36xf32>, vector<36x256xf32>, vector<8x256xf32> -> vector<8x256xf32>
    %c0_7 = arith.constant 0 : index
    %c0_8 = arith.constant 0 : index
    %8 = vector.load %arg5[%c0_7, %c0_8] : memref<16x36xf32, #tpu.memory_space<vmem>>, vector<16x36xf32>
    %cst_9 = arith.constant dense<0.000000e+00> : vector<16x256xf32>
    %9 = tpu.matmul %8, %5, %cst_9 {dimension_numbers = #tpu.dot_dimension_numbers<[1], [0], [0], [1], [0, 0, 1, 1], [], []>} : vector<16x36xf32>, vector<36x256xf32>, vector<16x256xf32> -> vector<16x256xf32>
    %c0_10 = arith.constant 0 : index
    %c0_11 = arith.constant 0 : index
    %10 = vector.load %arg6[%c0_10, %c0_11] : memref<16x1xf32, #tpu.memory_space<vmem>>, vector<16x1xf32>
    %11 = vector.broadcast %10 : vector<16x1xf32> to vector<16x256xf32>
    %12 = arith.addf %9, %11 : vector<16x256xf32>
    %13 = vector.extract_strided_slice %12 {offsets = [0, 0], sizes = [8, 256], strides = [1, 1]} : vector<16x256xf32> to vector<8x256xf32>
    %cst_12 = arith.constant 0.000000e+00 : f32
    %14 = vector.broadcast %cst_12 : f32 to vector<8x256xf32>
    %15 = arith.maximumf %13, %14 : vector<8x256xf32>
    %16 = math.absf %13 : vector<8x256xf32>
    %cst_13 = arith.constant 0.000000e+00 : f32
    %17 = vector.broadcast %cst_13 : f32 to vector<8x256xf32>
    %18 = arith.subf %17, %16 : vector<8x256xf32>
    %19 = math.exp %18 : vector<8x256xf32>
    %cst_14 = arith.constant 1.000000e+00 : f32
    %20 = vector.broadcast %cst_14 : f32 to vector<8x256xf32>
    %21 = arith.addf %20, %19 : vector<8x256xf32>
    %22 = math.log %21 : vector<8x256xf32>
    %23 = arith.addf %15, %22 : vector<8x256xf32>
    %24 = vector.extract_strided_slice %12 {offsets = [8, 0], sizes = [8, 256], strides = [1, 1]} : vector<16x256xf32> to vector<8x256xf32>
    %25 = arith.mulf %23, %7 : vector<8x256xf32>
    %26 = arith.addf %25, %24 : vector<8x256xf32>
    %c0_15 = arith.constant 0 : index
    %c0_16 = arith.constant 0 : index
    %c0_17 = arith.constant 0 : index
    %27 = vector.load %arg7[%c0_15, %c0_16, %c0_17] : memref<1x8x256xf32, #tpu.memory_space<vmem>>, vector<1x8x256xf32>
    %28 = vector.shape_cast %27 : vector<1x8x256xf32> to vector<8x256xf32>
    %29 = vector.shape_cast %26 : vector<8x256xf32> to vector<1x8x256xf32>
    tpu.vector_store %arg7[%c0_15, %c0_16, %c0_17], %29 {strides = array<i32>} : memref<1x8x256xf32, #tpu.memory_space<vmem>>, vector<1x8x256xf32>,
    return
  }
  func.func @transform_0(%arg0: i32, %arg1: i32) -> (i32, i32, i32) {
    %c0_i32 = arith.constant 0 : i32
    %c0_i32_0 = arith.constant 0 : i32
    return %arg0, %c0_i32, %arg1 : i32, i32, i32
  }
  func.func @transform_1(%arg0: i32, %arg1: i32) -> (i32, i32, i32) {
    %c0_i32 = arith.constant 0 : i32
    %c0_i32_0 = arith.constant 0 : i32
    return %arg0, %c0_i32, %arg1 : i32, i32, i32
  }
  func.func @transform_2(%arg0: i32, %arg1: i32) -> (i32, i32) {
    %c0_i32 = arith.constant 0 : i32
    %c0_i32_0 = arith.constant 0 : i32
    %c0_i32_1 = arith.constant 0 : i32
    return %c0_i32, %c0_i32_0 : i32, i32
  }
  func.func @transform_3(%arg0: i32, %arg1: i32) -> (i32, i32) {
    %c0_i32 = arith.constant 0 : i32
    %c0_i32_0 = arith.constant 0 : i32
    %c0_i32_1 = arith.constant 0 : i32
    return %c0_i32, %c0_i32_0 : i32, i32
  }
  func.func @transform_4(%arg0: i32, %arg1: i32) -> (i32, i32) {
    %c0_i32 = arith.constant 0 : i32
    %c0_i32_0 = arith.constant 0 : i32
    %c0_i32_1 = arith.constant 0 : i32
    return %c0_i32, %c0_i32_0 : i32, i32
  }
  func.func @transform_5(%arg0: i32, %arg1: i32) -> (i32, i32, i32) {
    %c0_i32 = arith.constant 0 : i32
    %c0_i32_0 = arith.constant 0 : i32
    return %arg0, %c0_i32, %arg1 : i32, i32, i32
  }
}

</mosaic_0001>

<bundles_post_ra>
// kernel: context_softplus_wn_conv2d.1
= control target key start
LH: loop header
LB: loop body
LE: loop exit
PB: predicated region body
PF: predicated region fallthrough
CT: control target
= control target key end

     0   :  { %s792_s18 = smov 0   ;;  %s794_s19 = smov 0   ;;  %s851_s0 = inlined_call_operand.vmem [shape: bf16[2,36,256], index: 0, kind: input, shape index: {}]   ;;  %s852_s1 = inlined_call_operand.vmem [shape: bf16[2,36,256], index: 1, kind: input, shape index: {}]   ;;  %s853_s2 = inlined_call_operand.vmem [shape: f32[8,36], index: 2, kind: input, shape index: {}]   ;;  %s854_s3 = inlined_call_operand.vmem [shape: f32[16,36], index: 3, kind: input, shape index: {}]   ;;  %s855_s4 = inlined_call_operand.vmem [shape: f32[16,1], index: 4, kind: input, shape index: {}]   ;;  %s856_s5 = inlined_call_operand.vmem [shape: f32[2,8,256], index: 5, kind: output, shape index: {}]  }
   0x1   :  { %s796_s20 = smov 0  }
   0x2 LB: > { %s27_s21 = sadd.s32 1, %s754_s19  ;;  %p649_p0 = scmp.ge.s32.totalorder %s758_s20, 1  ;;  %s758_s20 = sphi %s796_s20, %s15_s20   ;;  %s754_s19 = sphi %s794_s19, %s858_s19   ;;  %s750_s18 = sphi %s792_s18, %s857_s18  }
   0x3   : > { %p29_p1 = scmp.ge.s32.totalorder %s27_s21, 2  ;;  %p225_p2 = scmp.lt.s32.totalorder %s758_s20, 3 }
   0x5   : > { %s860_s21 = smov (%p29_p1, %s27_s21), 0  ;;  %p226_p3 = pnand %p649_p0, %p225_p2 }
   0x6   : > { %p271_p4 = scmp.lt.s32.totalorder (!%p226_p3), %s750_s18, 1  ;;  %v760_v0 = vmov (!%p226_p3), 0.0   ;;  %v415_v1 = vld [vmem:[%s855_s4] sm:$0xff] (!%p226_p3)  ;;  %v761_v2 = vmov (!%p226_p3), 0   ;;  %v416_v3 = vld [vmem:[%s855_s4 + $0x8] sm:$0xff] (!%p226_p3)  ;;  %vm335_vm0 = vcmask (!%p226_p3), 1043456  }
   0x7   : > { %229 = sbr.rel (%p226_p3) target bundleno = 283 (0x11b), region = 40  ;;  %503 = vmatprep.mubr.f32.mxu1 (!%p226_p3), %v760_v0  ;;  %406 = vmatprep.mubr.f32.mxu0 (!%p226_p3), %v760_v0  ;;  %vm331_vm1 = vcmask (!%p226_p3), 293888   ;;  %v413_v17 = vld [vmem:[%s854_s3] sm:$0xff] (!%p226_p3)  ;;  %v414_v20 = vld [vmem:[%s854_s3 + $0x8] sm:$0xff] (!%p226_p3) }
   0x8   : > { %715 = vset.pattern.permute.xlu0 (!%p226_p3), %v761_v2  ;;  %v330_v19 = vld [vmem:[%s853_s2] sm:$0xff] (!%p226_p3) }
   0x9   : > { %419 = vperm.xlu0 (!%p226_p3), %715, %v415_v1  }
   0xd   : > { %424 = vperm.xlu0 (!%p226_p3), %715, %v416_v3  }
   0xe   : > { %s862_s18 = smov (!%p271_p4, %s750_s18), 1 }
   0xf   : > { %s688_s24 = smul.u32 40, %s862_s18  ;;  %s663_s14 = sshll.u32 %s862_s18, 4 }
  0x10   : > { %s298_s17 = scalar_lea.vmem %s856_s5, %s663_s14 }
  0x11   : > { %s288_s29 = scalar_lea.vmem %s852_s1, %s688_s24  ;;  %s278_s7 = scalar_lea.vmem %s851_s0, %s688_s24 }
  0x12   : > { %v716_v4 = vld [vmem:[%s288_s29 + $0x4] ss:$8 sps:$4 sm:$0xff]   ;;  %v718_v5 = vld [vmem:[%s288_s29] ss:$8 sps:$4 sm:$0xff]   ;;  %v719_v6 = vld [vmem:[%s288_s29 + $0x14] ss:$8 sps:$4 sm:$0xff]  }
  0x13   : > { %673 = vmatprep.subr.bf16.mxu1 %v716_v4  ;;  %v721_v7 = vld [vmem:[%s288_s29 + $0x10] ss:$8 sps:$4 sm:$0xff]   ;;  %v319_v8 = vld [vmem:[%s288_s29 + $0x20] sm:$0x33]  ;;  %v725_v12 = vld [vmem:[%s278_s7 + $0x14] ss:$8 sps:$4 sm:$0xff]  }
  0x14   : > { %675 = vmatpush1.bf16.msra.mxu1 %v718_v5  ;;  %v722_v9 = vld [vmem:[%s278_s7 + $0x4] ss:$8 sps:$4 sm:$0xff]   ;;  %v329_v10 = vunpack.c.h.bf16 %v319_v8  ;;  %v724_v11 = vld [vmem:[%s278_s7] ss:$8 sps:$4 sm:$0xff]   ;;  %v727_v14 = vld [vmem:[%s278_s7 + $0x10] ss:$8 sps:$4 sm:$0xff]   ;;  %v328_v15 = vunpack.c.l.bf16 %v319_v8 }
  0x15   : > { %677 = vmatprep.subr.bf16.mxu1 %v719_v6  ;;  %665 = vmatprep.subr.bf16.mxu0 %v722_v9  ;;  %v304_v13 = vld [vmem:[%s278_s7 + $0x20] sm:$0x33] }
  0x16   : > { %667 = vmatpush1.bf16.msra.mxu0 %v724_v11  ;;  %v314_v16 = vunpack.c.h.bf16 %v304_v13  ;;  %v313_v18 = vunpack.c.l.bf16 %v304_v13 }
  0x17   : > { %669 = vmatprep.subr.bf16.mxu0 %v725_v12 }
  0x18   : > { %679 = vmatpush1.bf16.msra.mxu1 %v721_v7 }
  0x19   : > { %657 = vmatprep.subr.msk.mxu1 %vm335_vm0, %v329_v10 }
  0x1a   : > { %671 = vmatpush1.bf16.msra.mxu0 %v727_v14 }
  0x1b   : > { %654 = vmatprep.subr.msk.mxu0 %vm335_vm0, %v314_v16 }
  0x1c   : > { %658 = vmatpush1.msk.msra.mxu1 %vm335_vm0, %v328_v15 }
  0x1d   : > { %659 = vmatmul.mubr.msk.f32.vlgmr.msra.gmra.mrb[0].mxu1 %vm331_vm1, %v413_v17 }
  0x1e   : > { %509 = vmatprep.mubr.f32.mxu1 %v760_v0  ;;  %655 = vmatpush1.msk.msra.mxu0 %vm335_vm0, %v313_v18 }
  0x1f   : > { %656 = vmatmul.mubr.msk.f32.vlgmr.msra.gmra.mrb[0].mxu0 %vm331_vm1, %v330_v19 }
  0x21   : > { %660 = vmatmul.mubr.msk.f32.gmra.mrb[2].mxu1 %vm331_vm1, %v414_v20 }
  0x88   : > { %v420_v21 = vpop.permute.xlu0 %419 }
  0x8c   : > { %v425_v47 = vpop.permute.xlu0 %424 }
  0xf0   : > { %v505_v22 = vpop.f32.mrb[0].mxu1 }
  0xf1   : > { %v506_v23 = vadd.f32 %v505_v22, %v420_v21  ;;  %v507_v24 = vpop.f32.mrb[1].mxu1 }
  0xf2   : > { %v508_v25 = vadd.f32 %v507_v24, %v420_v21  ;;  %v408_v27 = vpop.f32.mrb[0].mxu0 }
  0xf3   : > { %v518_v26 = vand.u32 2147483647, %v506_v23  ;;  %v410_v30 = vpop.f32.mrb[1].mxu0  ;;  %v516_v42 = vmax.f32 %v506_v23, 0.0 }
  0xf4   : > { %v519_v28 = vand.u32 2147483647, %v508_v25  ;;  %v511_v29 = vpop.f32.mrb[2].mxu1  ;;  %v517_v44 = vmax.f32 %v508_v25, 0.0 }
  0xf5   : > { %v520_v31 = vsub.f32 0.0, %v518_v26  ;;  %v513_v32 = vpop.f32.mrb[3].mxu1  ;;  %v512_v49 = vadd.f32 %v511_v29, %v425_v47 }
  0xf6   : > { %v521_v33 = vsub.f32 0.0, %v519_v28  ;;  %v514_v51 = vadd.f32 %v513_v32, %v425_v47 }
  0xf7   : > { %v522_v34 = vmul.f32 1.442695, %v520_v31 }
  0xf8   : > { %v524_v35 = vmul.f32 1.442695, %v521_v33 }
  0xf9   : > { %728 = vpow2.f32 %v522_v34 }
  0xfa   : > { %730 = vpow2.f32 %v524_v35 }
 0x103   : > { %v729_v36 = vpop.eup %728 }
 0x104   : > { %v731_v37 = vpop.eup %730  ;;  %v526_v38 = vadd.f32 1.0, %v729_v36 }
 0x105   : > { %v527_v39 = vadd.f32 1.0, %v731_v37 }
 0x106   : > { %732 = vlog2.f32 %v526_v38 }
 0x107   : > { %734 = vlog2.f32 %v527_v39 }
 0x110   : > { %v733_v40 = vpop.eup %732 }
 0x111   : > { %v735_v41 = vpop.eup %734  ;;  %v529_v43 = vmul.f32 0.6931472, %v733_v40 }
 0x112   : > { %v531_v45 = vmul.f32 0.6931472, %v735_v41 }
 0x113   : > { %v532_v46 = vadd.f32 %v529_v43, %v516_v42 }
 0x114   : > { %v533_v48 = vadd.f32 %v531_v45, %v517_v44 }
 0x115   : > { %v534_v50 = vmul.f32 %v532_v46, %v408_v27 }
 0x116   : > { %v535_v52 = vmul.f32 %v533_v48, %v410_v30 }
 0x117   : > { %v536_v53 = vadd.f32 %v534_v50, %v512_v49 }
 0x118   : > { %v537_v54 = vadd.f32 %v535_v52, %v514_v51 }
 0x119   : > { %538 = vst [vmem:[%s298_s17] sm:$0xff] %v536_v53 }
 0x11a   : > { %539 = vst [vmem:[%s298_s17 + $0x8] sm:$0xff] %v537_v54 }
 0x11b PF: > { %s15_s20 = sadd.s32 1, %s758_s20   ;;  %s857_s18 = smov %s754_s19 }
 0x11c   : > { %p12_p5 = scmp.ge.s32.totalorder %s15_s20, 4   ;;  %s858_s19 = smov %s860_s21 }
 0x11e   :  { %14 = sbr.rel (!%p12_p5) target bundleno = 2 (0x2), region = 73 }

</bundles_post_ra>
